<compile_context>
chip_gen: v7x
topology: tpu7x:2x2x1
jax: 0.10.0
libtpu: 0.0.40
codegen_flags: <defaults>
</compile_context>

<pallas_src>
import jax
import jax.numpy as jnp
from jax.experimental import pallas as pl
from jax.experimental.pallas import tpu as pltpu

LANE = 128      # vreg lane width
SUBLANE = 8     # f32 sublane count


def _round_up(n, m):
    return (n + m - 1) // m * m


def _mlp_kernel(x_ref, *refs):
    """refs = (w1, b1, w2, b2, ..., wL, bL, out_ref). All lane-padded to 128."""
    out_ref = refs[-1]
    param_refs = refs[:-1]
    n_layers = len(param_refs) // 2

    h = x_ref[...]
    if h.dtype != jnp.float32:
        h = h.astype(jnp.float32)

    for i in range(n_layers):
        w = param_refs[2 * i][...]
        b = param_refs[2 * i + 1][...]
        h = jnp.dot(h, w, preferred_element_type=jnp.float32) + b
        if i < n_layers - 1:  # last ReLU popped in the PyTorch module
            h = jnp.maximum(h, 0.0)

    out_ref[...] = h.astype(out_ref.dtype)


def init_linear_params(key, hidden_sizes, dtype=jnp.float32):
    """Init mimicking torch.nn.Linear default: U(-1/sqrt(fan_in), +1/sqrt(fan_in))."""
    params = []
    for h, h_next in zip(hidden_sizes, hidden_sizes[1:]):
        key, kw, kb = jax.random.split(key, 3)
        bound = 1.0 / jnp.sqrt(jnp.asarray(h, dtype))
        w = jax.random.uniform(kw, (h, h_next), dtype, minval=-bound, maxval=bound)
        b = jax.random.uniform(kb, (1, h_next), dtype, minval=-bound, maxval=bound)
        params.append((w, b))
    return params


def linear_parameterizer_forward(x, params, num_concepts, num_classes,
                                 *, block_batch=512):
    """x: (BATCH, hidden_sizes[0]) -> (BATCH, num_concepts, num_classes)."""
    batch, in_features = x.shape
    out_features = params[-1][0].shape[1]
    assert out_features == num_concepts * num_classes

    # --- batch tiling (sublane-aligned, ragged tail padded with zero rows) ---
    tb = _round_up(min(block_batch, _round_up(batch, SUBLANE)), SUBLANE)
    batch_pad = _round_up(batch, tb)

    # --- lane-dense feature padding (wrapper-side, once) ---
    in_pad = _round_up(in_features, LANE)
    x_pad = jnp.pad(x, ((0, batch_pad - batch), (0, in_pad - in_features)))

    flat_params = []
    param_specs = []
    for w, b in params:
        fi, fo = w.shape
        fi_p, fo_p = _round_up(fi, LANE), _round_up(fo, LANE)
        w_p = jnp.pad(w, ((0, fi_p - fi), (0, fo_p - fo)))
        b_p = jnp.pad(b.reshape(1, fo), ((0, 0), (0, fo_p - fo)))
        flat_params += [w_p, b_p]
        # Constant index maps -> parameters stay resident in VMEM across the grid.
        param_specs += [
            pl.BlockSpec((fi_p, fo_p), lambda i: (0, 0)),
            pl.BlockSpec((1, fo_p), lambda i: (0, 0)),
        ]
    out_pad = _round_up(out_features, LANE)

    grid = (batch_pad // tb,)
    x_spec = pl.BlockSpec((tb, in_pad), lambda i: (i, 0))
    out_spec = pl.BlockSpec((tb, out_pad), lambda i: (i, 0))

    out = pl.pallas_call(
        _mlp_kernel,
        out_shape=jax.ShapeDtypeStruct((batch_pad, out_pad), jnp.float32),
        grid=grid,
        in_specs=[x_spec] + param_specs,
        out_specs=out_spec,
        compiler_params=pltpu.CompilerParams(
            dimension_semantics=("parallel",),  # shards batch tiles across TCs on v7x
        ),
    )(x_pad, *flat_params)

    # TODO(synk): for HBM-bound production batches, switch x/out to bfloat16 at
    # this boundary (f32 accumulation inside the kernel is already in place).
    return out[:batch, :out_features].reshape(batch, num_concepts, num_classes)


def reference_forward(x, params):
    h = x
    for i, (w, b) in enumerate(params):
        h = h @ w + b
        if i < len(params) - 1:
            h = jnp.maximum(h, 0.0)
    return h


if __name__ == "__main__":
    num_concepts = 5
    num_classes = 2
    hidden_sizes = (10, 5, 5, 10)  # hidden_sizes[-1] == num_concepts * num_classes
    batch = 40                     # small, but ragged vs block_batch=16 -> exercises grid + tail padding

    key = jax.random.PRNGKey(0)
    key, kx = jax.random.split(key)
    x = jax.random.normal(kx, (batch, hidden_sizes[0]), jnp.float32)
    params = init_linear_params(key, hidden_sizes)

    theta = linear_parameterizer_forward(x, params, num_concepts, num_classes,
                                         block_batch=16)
    theta = jax.block_until_ready(theta)

    ref = reference_forward(x, params).reshape(batch, num_concepts, num_classes)
    assert theta.shape == (batch, num_concepts, num_classes)
    assert jnp.allclose(theta, ref, atol=1e-5, rtol=1e-5)

    print("KERNEL_OK")
</pallas_src>

<mosaic_0001>
module attributes {stable_mosaic.version = 11 : i64} {
  func.func @_mlp_kernel(%arg0: i32, %arg1: memref<16x128xf32, #tpu.memory_space<vmem>>, %arg2: memref<128x128xf32, #tpu.memory_space<vmem>>, %arg3: memref<1x128xf32, #tpu.memory_space<vmem>>, %arg4: memref<128x128xf32, #tpu.memory_space<vmem>>, %arg5: memref<1x128xf32, #tpu.memory_space<vmem>>, %arg6: memref<128x128xf32, #tpu.memory_space<vmem>>, %arg7: memref<1x128xf32, #tpu.memory_space<vmem>>, %arg8: memref<16x128xf32, #tpu.memory_space<vmem>>) attributes {dimension_semantics = [#tpu.dimension_semantics<parallel>], iteration_bounds = array<i64: 3>, scalar_prefetch = 0 : i64, scratch_operands = 0 : i64, tpu.core_type = #tpu.core_type<tc>, window_params = [{transform_indices = @transform_0, window_bounds = array<i64: 16, 128>}, {pipeline_mode = #tpu.pipeline_mode<synchronous>, transform_indices = @transform_1, window_bounds = array<i64: 128, 128>}, {pipeline_mode = #tpu.pipeline_mode<synchronous>, transform_indices = @transform_2, window_bounds = array<i64: 1, 128>}, {pipeline_mode = #tpu.pipeline_mode<synchronous>, transform_indices = @transform_3, window_bounds = array<i64: 128, 128>}, {pipeline_mode = #tpu.pipeline_mode<synchronous>, transform_indices = @transform_4, window_bounds = array<i64: 1, 128>}, {pipeline_mode = #tpu.pipeline_mode<synchronous>, transform_indices = @transform_5, window_bounds = array<i64: 128, 128>}, {pipeline_mode = #tpu.pipeline_mode<synchronous>, transform_indices = @transform_6, window_bounds = array<i64: 1, 128>}, {transform_indices = @transform_7, window_bounds = array<i64: 16, 128>}]} {
    %c0 = arith.constant 0 : index
    %c0_0 = arith.constant 0 : index
    %0 = vector.load %arg1[%c0, %c0_0] : memref<16x128xf32, #tpu.memory_space<vmem>>, vector<16x128xf32>
    %c0_1 = arith.constant 0 : index
    %c0_2 = arith.constant 0 : index
    %1 = vector.load %arg2[%c0_1, %c0_2] : memref<128x128xf32, #tpu.memory_space<vmem>>, vector<128x128xf32>
    %c0_3 = arith.constant 0 : index
    %c0_4 = arith.constant 0 : index
    %2 = vector.load %arg3[%c0_3, %c0_4] : memref<1x128xf32, #tpu.memory_space<vmem>>, vector<1x128xf32>
    %cst = arith.constant dense<0.000000e+00> : vector<16x128xf32>
    %3 = tpu.matmul %0, %1, %cst {dimension_numbers = #tpu.dot_dimension_numbers<[1], [0], [0], [1], [0, 0, 1, 1], [], []>} : vector<16x128xf32>, vector<128x128xf32>, vector<16x128xf32> -> vector<16x128xf32>
    %4 = vector.broadcast %2 : vector<1x128xf32> to vector<16x128xf32>
    %5 = arith.addf %3, %4 : vector<16x128xf32>
    %cst_5 = arith.constant 0.000000e+00 : f32
    %6 = vector.broadcast %cst_5 : f32 to vector<16x128xf32>
    %7 = arith.maximumf %5, %6 : vector<16x128xf32>
    %c0_6 = arith.constant 0 : index
    %c0_7 = arith.constant 0 : index
    %8 = vector.load %arg4[%c0_6, %c0_7] : memref<128x128xf32, #tpu.memory_space<vmem>>, vector<128x128xf32>
    %c0_8 = arith.constant 0 : index
    %c0_9 = arith.constant 0 : index
    %9 = vector.load %arg5[%c0_8, %c0_9] : memref<1x128xf32, #tpu.memory_space<vmem>>, vector<1x128xf32>
    %cst_10 = arith.constant dense<0.000000e+00> : vector<16x128xf32>
    %10 = tpu.matmul %7, %8, %cst_10 {dimension_numbers = #tpu.dot_dimension_numbers<[1], [0], [0], [1], [0, 0, 1, 1], [], []>} : vector<16x128xf32>, vector<128x128xf32>, vector<16x128xf32> -> vector<16x128xf32>
    %11 = vector.broadcast %9 : vector<1x128xf32> to vector<16x128xf32>
    %12 = arith.addf %10, %11 : vector<16x128xf32>
    %cst_11 = arith.constant 0.000000e+00 : f32
    %13 = vector.broadcast %cst_11 : f32 to vector<16x128xf32>
    %14 = arith.maximumf %12, %13 : vector<16x128xf32>
    %c0_12 = arith.constant 0 : index
    %c0_13 = arith.constant 0 : index
    %15 = vector.load %arg6[%c0_12, %c0_13] : memref<128x128xf32, #tpu.memory_space<vmem>>, vector<128x128xf32>
    %c0_14 = arith.constant 0 : index
    %c0_15 = arith.constant 0 : index
    %16 = vector.load %arg7[%c0_14, %c0_15] : memref<1x128xf32, #tpu.memory_space<vmem>>, vector<1x128xf32>
    %cst_16 = arith.constant dense<0.000000e+00> : vector<16x128xf32>
    %17 = tpu.matmul %14, %15, %cst_16 {dimension_numbers = #tpu.dot_dimension_numbers<[1], [0], [0], [1], [0, 0, 1, 1], [], []>} : vector<16x128xf32>, vector<128x128xf32>, vector<16x128xf32> -> vector<16x128xf32>
    %18 = vector.broadcast %16 : vector<1x128xf32> to vector<16x128xf32>
    %19 = arith.addf %17, %18 : vector<16x128xf32>
    %c0_17 = arith.constant 0 : index
    %c0_18 = arith.constant 0 : index
    %20 = vector.load %arg8[%c0_17, %c0_18] : memref<16x128xf32, #tpu.memory_space<vmem>>, vector<16x128xf32>
    tpu.vector_store %arg8[%c0_17, %c0_18], %19 {strides = array<i32>} : memref<16x128xf32, #tpu.memory_space<vmem>>, vector<16x128xf32>,
    return
  }
  func.func @transform_0(%arg0: i32) -> (i32, i32) {
    %c0_i32 = arith.constant 0 : i32
    %c0_i32_0 = arith.constant 0 : i32
    return %arg0, %c0_i32 : i32, i32
  }
  func.func @transform_1(%arg0: i32) -> (i32, i32) {
    %c0_i32 = arith.constant 0 : i32
    %c0_i32_0 = arith.constant 0 : i32
    %c0_i32_1 = arith.constant 0 : i32
    return %c0_i32, %c0_i32_0 : i32, i32
  }
  func.func @transform_2(%arg0: i32) -> (i32, i32) {
    %c0_i32 = arith.constant 0 : i32
    %c0_i32_0 = arith.constant 0 : i32
    %c0_i32_1 = arith.constant 0 : i32
    return %c0_i32, %c0_i32_0 : i32, i32
  }
  func.func @transform_3(%arg0: i32) -> (i32, i32) {
    %c0_i32 = arith.constant 0 : i32
    %c0_i32_0 = arith.constant 0 : i32
    %c0_i32_1 = arith.constant 0 : i32
    return %c0_i32, %c0_i32_0 : i32, i32
  }
  func.func @transform_4(%arg0: i32) -> (i32, i32) {
    %c0_i32 = arith.constant 0 : i32
    %c0_i32_0 = arith.constant 0 : i32
    %c0_i32_1 = arith.constant 0 : i32
    return %c0_i32, %c0_i32_0 : i32, i32
  }
  func.func @transform_5(%arg0: i32) -> (i32, i32) {
    %c0_i32 = arith.constant 0 : i32
    %c0_i32_0 = arith.constant 0 : i32
    %c0_i32_1 = arith.constant 0 : i32
    return %c0_i32, %c0_i32_0 : i32, i32
  }
  func.func @transform_6(%arg0: i32) -> (i32, i32) {
    %c0_i32 = arith.constant 0 : i32
    %c0_i32_0 = arith.constant 0 : i32
    %c0_i32_1 = arith.constant 0 : i32
    return %c0_i32, %c0_i32_0 : i32, i32
  }
  func.func @transform_7(%arg0: i32) -> (i32, i32) {
    %c0_i32 = arith.constant 0 : i32
    %c0_i32_0 = arith.constant 0 : i32
    return %arg0, %c0_i32 : i32, i32
  }
}

</mosaic_0001>

<bundles_post_ra>
// kernel: tpu_custom_call.1
= control target key start
LH: loop header
LB: loop body
LE: loop exit
PB: predicated region body
PF: predicated region fallthrough
CT: control target
= control target key end

     0   :  { %12 = vsyncpa [#allocation3], 0  ;;  %s1647_s0 = inlined_call_operand.hbm [shape: f32[48,128], index: 0, kind: input, shape index: {}]   ;;  %s1648_s1 = inlined_call_operand.hbm [shape: f32[128,128], index: 1, kind: input, shape index: {}]   ;;  %s1649_s2 = inlined_call_operand.vmem [shape: f32[1,128], index: 2, kind: input, shape index: {}]   ;;  %s1650_s3 = inlined_call_operand.hbm [shape: f32[128,128], index: 3, kind: input, shape index: {}]   ;;  %s1651_s4 = inlined_call_operand.vmem [shape: f32[1,128], index: 4, kind: input, shape index: {}]   ;;  %s1652_s5 = inlined_call_operand.hbm [shape: f32[128,128], index: 5, kind: input, shape index: {}]   ;;  %s1653_s6 = inlined_call_operand.vmem [shape: f32[1,128], index: 6, kind: input, shape index: {}]   ;;  %s1654_s7 = inlined_call_operand.hbm [shape: f32[48,128], index: 7, kind: output, shape index: {}]  }
   0x1   :  { %14 = vsyncpa [#allocation3 + $0x1], 0 }
   0x2   :  { %15 = vsyncpa [#allocation6], 0 }
   0x3   :  { %16 = vsyncpa [#allocation9], 0 }
   0x4   :  { %17 = vsyncpa [#allocation4], 0 }
   0x5   :  { %19 = vsyncpa [#allocation4 + $0x1], 0  ;;  %s1361_s24 = smov 0   ;;  %s1363_s25 = smov 0  }
   0x6   :  { %s1365_s26 = smov 0   ;;  %s1367_s27 = smov 0  }
   0x7 LB: > { %s1382_s28 = sadd.s32 4294967295, %s1310_s27   ;;  %s761_s29 = sadd.s32 4294967294, %s1310_s27   ;;  %s1310_s27 = sphi %s1367_s27, %s1679_s27   ;;  %s1306_s26 = sphi %s1365_s26, %s1678_s26   ;;  %s1302_s25 = sphi %s1363_s25, %s1677_s25   ;;  %s1298_s24 = sphi %s1361_s24, %s1676_s24  }
   0x8   : > { %p45_p0 = scmp.ne.s32.totalorder %s1302_s25, %s1298_s24  ;;  %p1655_p1 = scmp.eq.s32.totalorder %s1382_s28, 0 }
   0x9   : > { %p201_p3 = scmp.eq.s32.totalorder %s761_s29, 2  ;;  %p762_p5 = scmp.ge.s32.totalorder %s1310_s27, 1 }
   0xa   : > { %p1391_p4 = por %p1655_p1, %p45_p0  ;;  %p208_p7 = scmp.lt.s32.totalorder %s1310_s27, 4 }
   0xb   : > { %p1396_p6 = por %p201_p3, %p45_p0  ;;  %s1312_s10 = smov [#allocation5]  }
   0xc   : > { %s1659_s30 = scalar_select %p1391_p4, 1, 0 }
   0xd   : > { %s1660_s8 = scalar_select %p1396_p6, 1, 0 }
   0xe   : > { %p1401_p8 = pnand %p762_p5, %p208_p7  ;;  %s220_s11 = sshll.u32 %s1312_s10, 4  ;;  %s1405_s11 = int_to_ptr.vmem [resolvable:$true] %s220_s11 }
   0xf   : > { %1661 = sst [smem:[#allocation15_spill]] %s1660_s8  ;;  %s1313_s13 = smov [#allocation7]  }
  0x10   : > { %s1662_s9 = scalar_select %p1401_p8, 1, 0 }
  0x11   : > { %p1057_p9 = pneg %p1401_p8  ;;  %s236_s14 = sshll.u32 %s1313_s13, 4  ;;  %s1415_s14 = int_to_ptr.vmem [resolvable:$true] %s236_s14 }
  0x12   : > { %s1314_s15 = smov [#allocation8]   ;;  %s1122_s19 = scalar_lea.hbm %s1648_s1, 2048 }
  0x13   : > { %p1411_p10 = pnand %p1057_p9, %p1655_p1  ;;  %s1417_s16 = sshll.u32 %s1314_s15, 4  ;;  %s253_s16 = int_to_ptr.vmem [resolvable:$true] %s1417_s16 }
  0x14   : > { %p1123_p11 = scmp.ne.s32.totalorder %s1648_s1, %s1122_s19  ;;  %p1129_p3 = scmp.lt.u32.totalorder %s1122_s19, %s1648_s1 }
  0x15   : > { %p1427_p12 = pneg %p1411_p10 }
  0x17   : > { %p1125_p13 = pnand %p1427_p12, %p1123_p11 }
  0x19   : > { %p1126_p0 = pneg %p1125_p13 }
  0x1b   : > { %p1131_p5 = pnand %p1129_p3, %p1126_p0 }
  0x1d   : > { %1134 = shalt.err (!%p1131_p5)
}
  0x1e   : > { %s1135_s10 = scalar_lea.vmem %s1405_s11, 2048  ;;  %p1143_p2 = scmp.lt.s32.totalorder %s1405_s11, %s1405_s11 }
  0x1f   : > { %p1136_p7 = scmp.ne.s32.totalorder %s1405_s11, %s1135_s10  ;;  %p1144_p6 = scmp.lt.s32.totalorder %s1135_s10, %s1135_s10 }
  0x21   : > { %p1138_p9 = pnand %p1136_p7, %p1427_p12  ;;  %p1145_p11 = por %p1144_p6, %p1143_p2 }
  0x23   : > { %p1139_p1 = pneg %p1138_p9 }
  0x25   : > { %p1146_p13 = pnand %p1145_p11, %p1139_p1 }
  0x27   : > { %1149 = shalt.err (!%p1146_p13)
}
  0x28   : > { %s1315_s13 = smov 128   ;;  %s1316_s15 = smov 8  }
  0x29   : > { %1060 = dma.hbm_to_vmem [thread:$0]  (!%p1411_p10), %s1648_s1, 2048, %s1405_s11, [#allocation6], %s1315_s13, %s1315_s13, %s1316_s15  }
  0x2a   : > { %s1150_s21 = scalar_lea.hbm %s1650_s3, 2048 }
  0x2b   : > { %p1151_p1 = scmp.ne.s32.totalorder %s1650_s3, %s1150_s21  ;;  %p1157_p0 = scmp.lt.u32.totalorder %s1150_s21, %s1650_s3 }
  0x2d   : > { %p1153_p2 = pnand %p1151_p1, %p1427_p12 }
  0x2f   : > { %p1154_p6 = pneg %p1153_p2 }
  0x31   : > { %p1159_p3 = pnand %p1157_p0, %p1154_p6 }
  0x33   : > { %1162 = shalt.err (!%p1159_p3)
}
  0x34   : > { %s1163_s11 = scalar_lea.vmem %s1415_s14, 2048  ;;  %p1171_p11 = scmp.lt.s32.totalorder %s1415_s14, %s1415_s14 }
  0x35   : > { %p1164_p5 = scmp.ne.s32.totalorder %s1415_s14, %s1163_s11  ;;  %p1172_p13 = scmp.lt.s32.totalorder %s1163_s11, %s1163_s11 }
  0x37   : > { %p1166_p7 = pnand %p1164_p5, %p1427_p12  ;;  %p1173_p1 = por %p1172_p13, %p1171_p11 }
  0x39   : > { %p1167_p9 = pneg %p1166_p7 }
  0x3b   : > { %p1174_p2 = pnand %p1173_p1, %p1167_p9 }
  0x3d   : > { %1177 = shalt.err (!%p1174_p2)
}
  0x3e   : > { %1063 = dma.hbm_to_vmem [thread:$0]  (!%p1411_p10), %s1650_s3, 2048, %s1415_s14, [#allocation6], %s1315_s13, %s1315_s13, %s1316_s15  }
  0x3f   : > { %s1178_s20 = scalar_lea.hbm %s1652_s5, 2048 }
  0x40   : > { %p1179_p6 = scmp.ne.s32.totalorder %s1652_s5, %s1178_s20  ;;  %p1185_p5 = scmp.lt.u32.totalorder %s1178_s20, %s1652_s5 }
  0x42   : > { %p1181_p0 = pnand %p1179_p6, %p1427_p12 }
  0x44   : > { %p1182_p3 = pneg %p1181_p0 }
  0x46   : > { %p1187_p7 = pnand %p1185_p5, %p1182_p3 }
  0x48   : > { %1190 = shalt.err (!%p1187_p7)
}
  0x49   : > { %s1191_s11 = scalar_lea.vmem %s253_s16, 2048  ;;  %p1199_p1 = scmp.lt.s32.totalorder %s253_s16, %s253_s16 }
  0x4a   : > { %p1192_p9 = scmp.ne.s32.totalorder %s253_s16, %s1191_s11  ;;  %p1200_p2 = scmp.lt.s32.totalorder %s1191_s11, %s1191_s11 }
  0x4c   : > { %p1194_p11 = pnand %p1192_p9, %p1427_p12  ;;  %p1201_p4 = por %p1200_p2, %p1199_p1 }
  0x4e   : > { %p1195_p13 = pneg %p1194_p11 }
  0x50   : > { %p1202_p8 = pnand %p1201_p4, %p1195_p13 }
  0x52   : > { %1205 = shalt.err (!%p1202_p8)
}
  0x53   : > { %1066 = dma.hbm_to_vmem [thread:$0]  (!%p1411_p10), %s1652_s5, 2048, %s253_s16, [#allocation9], %s1315_s13, %s1315_s13, %s1316_s15  }
  0x54   : > { %s1500_s22 = sadd.s32 1, %s1310_s27   ;;  %s32_s17 = sadd.s32 1, %s1306_s26 }
  0x55   : > { %s29_s12 = ssub.s32 %s1310_s27, %s1500_s22  ;;  %p39_p8 = scmp.ne.s32.totalorder %s1306_s26, %s1302_s25 }
  0x56   : > { %p30_p4 = scmp.eq.s32.totalorder %s29_s12, 0  ;;  %p40_p12 = scmp.eq.s32.totalorder %s1310_s27, 0 }
  0x57   : > { %p1078_p6 = scmp.lt.s32.totalorder %s1310_s27, 3  ;;  %p1665_p3 = scmp.eq.s32.totalorder %s1382_s28, 2 }
  0x58   : > { %s1510_s18 = scalar_select %p30_p4, %s1306_s26, %s32_s17  }
  0x59   : > { %p41_p0 = por %p40_p12, %p39_p8  ;;  %p1514_p5 = por %p1665_p3, %p39_p8 }
  0x5a   : > { %s269_s20 = sand.u32 1, %s1306_s26   ;;  %s784_s21 = sshll.u32 %s1310_s27, 8 }
  0x5b   : > { %s767_s16 = sshll.u32 %s269_s20, 4  ;;  %s1523_s10 = scalar_lea.hbm %s1647_s0, %s784_s21 }
  0x5c   : > { %s273_s11 = scalar_lea.vmem [#allocation2], %s767_s16  ;;  %p1525_p10 = pnand %p1078_p6, %p41_p0 }
  0x5d   : > { %s280_s14 = sshll.u32 %s273_s11, 4  ;;  %s1531_s12 = scalar_lea.sflag [#allocation3], %s269_s20  ;;  %s1529_s14 = int_to_ptr.vmem [resolvable:$true] %s280_s14 }
  0x5e   : > { %s1206_s17 = scalar_lea.hbm %s1523_s10, 256  ;;  %p1208_p9 = pneg %p1525_p10 }
  0x5f   : > { %p1207_p7 = scmp.ne.s32.totalorder %s1523_s10, %s1206_s17  ;;  %s1211_s23 = scalar_lea.hbm %s1647_s0, 768 }
  0x60   : > { %p1212_p1 = scmp.lt.u32.totalorder %s1523_s10, %s1647_s0  ;;  %p1213_p2 = scmp.lt.u32.totalorder %s1211_s23, %s1206_s17 }
  0x61   : > { %p1209_p11 = pnand %p1208_p9, %p1207_p7  ;;  %p1215_p8 = scmp.lt.u32.totalorder %s1206_s17, %s1523_s10 }
  0x62   : > { %p1214_p4 = por %p1213_p2, %p1212_p1 }
  0x63   : > { %p1210_p13 = pneg %p1209_p11 }
  0x64   : > { %p1216_p12 = por %p1215_p8, %p1214_p4 }
  0x66   : > { %p1217_p6 = pnand %p1216_p12, %p1210_p13 }
  0x68   : > { %1220 = shalt.err (!%p1217_p6)
}
  0x69   : > { %s1221_s20 = scalar_lea.vmem %s1529_s14, 256  ;;  %s1317_s21 = smov [#allocation2]  }
  0x6a   : > { %p1222_p0 = scmp.ne.s32.totalorder %s1529_s14, %s1221_s20  ;;  %s1226_s16 = sshll.u32 %s1317_s21, 4  ;;  %s1227_s16 = int_to_ptr.vmem [resolvable:$false] %s1226_s16 }
  0x6b   : > { %s1228_s29 = scalar_lea.vmem %s1227_s16, 512  ;;  %p1229_p11 = scmp.lt.s32.totalorder %s1529_s14, %s1227_s16 }
  0x6c   : > { %p1224_p3 = pnand %p1222_p0, %p1208_p9  ;;  %p1230_p1 = scmp.lt.s32.totalorder %s1228_s29, %s1221_s20 }
  0x6e   : > { %p1225_p7 = pneg %p1224_p3  ;;  %p1231_p2 = por %p1230_p1, %p1229_p11 }
  0x70   : > { %p1232_p4 = pnand %p1231_p2, %p1225_p7 }
  0x72   : > { %1235 = shalt.err (!%p1232_p4)
}
  0x73   : > { %1070 = dma.hbm_to_vmem [thread:$0]  (!%p1525_p10), %s1523_s10, 256, %s1529_s14, %s1531_s12, %s1315_s13, %s1315_s13, %s1316_s15  }
  0x74   : > { %p1668_p9 = scmp.ne.s32.totalorder %s1662_s9, 0 }
  0x75   : > { %s1565_s17 = sand.u32 (!%p1668_p9), 1, %s1302_s25   ;;  %p1669_p13 = scmp.ne.s32.totalorder (!%p1668_p9), %s1659_s30, 0 }
  0x76   : > { %292 = sbr.rel (%p1668_p9) target bundleno = 834 (0x342), region = 48  ;;  %s771_s23 = sshll.u32 (!%p1668_p9), %s1565_s17, 4 }
  0x77   : > { %s295_s11 = scalar_lea.sflag (!%p1668_p9), [#allocation3], %s1565_s17  ;;  %s1571_s8 = scalar_lea.vmem (!%p1668_p9), [#allocation2], %s771_s23 }
  0x7d   : > { %1281 = dma.done.wait (%p1669_p13), %s295_s11, 256  }
  0x7e   : > { %1283 = vsyncadd (%p1669_p13), %s295_s11, 4294967040  ;;  %p1670_p10 = scmp.eq.s32.totalorder %s1382_s28, 0 }
  0x80   : > { %1285 = dma.done.wait (%p1670_p10), [#allocation6], 4096   ;;  %p1671_p8 = pmov %p1670_p10 }
  0x82   : > { %1287 = vsyncadd (%p1671_p8), [#allocation6], 4294963200  ;;  %p1672_p12 = pmov %p1671_p8 }
  0x83   : > { %p1673_p6 = pmov %p1671_p8 }
  0x84   : > { %1289 = dma.done.wait (%p1672_p12), [#allocation9], 2048  }
  0x85   : > { %1291 = vsyncadd (%p1673_p6), [#allocation9], 4294965248  ;;  %v345_v0 = vld [vmem:[#allocation5] sm:$0xff]  ;;  %v346_v1 = vld [vmem:[#allocation5 + $0x8] sm:$0xff]  ;;  %s340_s10 = scalar_lea.vmem [#allocation10], %s771_s23  ;;  %s785_s21 = sshll.u32 %s1382_s28, 8 }
  0x86   : > { %v347_v2 = vld [vmem:[#allocation5 + $0x10] sm:$0xff]  ;;  %v945_v3 = vpack.c.bf16 %v346_v1, %v345_v0  ;;  %v348_v4 = vld [vmem:[#allocation5 + $0x18] sm:$0xff]  ;;  %v349_v6 = vld [vmem:[#allocation5 + $0x20] sm:$0xff]  ;;  %s659_s14 = sshll.u32 %s340_s10, 4  ;;  %s1604_s11 = scalar_lea.hbm %s1654_s7, %s785_s21  ;;  %s1599_s14 = int_to_ptr.vmem [resolvable:$true] %s659_s14 }
  0x87   : > { %v949_v5 = vpack.c.bf16 %v348_v4, %v347_v2  ;;  %v350_v7 = vld [vmem:[#allocation5 + $0x28] sm:$0xff]  ;;  %v351_v9 = vld [vmem:[#allocation5 + $0x30] sm:$0xff]  ;;  %v352_v10 = vld [vmem:[#allocation5 + $0x38] sm:$0xff]  ;;  %s646_s23 = scalar_lea.sflag [#allocation4], %s1565_s17  ;;  %s1318_s28 = smov [#allocation10]  }
  0x88   : > { %946 = vmatprep.subr.bf16.mxu0 %v945_v3  ;;  %v953_v8 = vpack.c.bf16 %v350_v7, %v349_v6  ;;  %v343_v11 = vld [vmem:[%s1571_s8] sm:$0xff]  ;;  %v446_v13 = vld [vmem:[#allocation7 + $0x8] sm:$0xff]  ;;  %v448_v16 = vld [vmem:[#allocation7 + $0x18] sm:$0xff]  ;;  %v957_v20 = vpack.c.bf16 %v352_v10, %v351_v9  ;;  %s1240_s30 = sshll.u32 %s1318_s28, 4  ;;  %s1241_s30 = int_to_ptr.vmem [resolvable:$false] %s1240_s30 }
  0x89   : > { %948 = vmatpush3.bf16.msra.mxu0 %v945_v3  ;;  %872 = vmatprep.mubr.f32.mxu0 %v343_v11  ;;  %v445_v12 = vld [vmem:[#allocation7] sm:$0xff]  ;;  %v447_v14 = vld [vmem:[#allocation7 + $0x10] sm:$0xff]  ;;  %v450_v19 = vld [vmem:[#allocation7 + $0x28] sm:$0xff]  ;;  %s1242_s9 = scalar_lea.vmem %s1241_s30, 512  ;;  %p1243_p11 = scmp.lt.s32.totalorder %s1599_s14, %s1241_s30 }
  0x8a   : > { %950 = vmatprep.subr.bf16.mxu0 %v949_v5  ;;  %v977_v15 = vpack.c.bf16 %v446_v13, %v445_v12  ;;  %v981_v17 = vpack.c.bf16 %v448_v16, %v447_v14  ;;  %v449_v18 = vld [vmem:[#allocation7 + $0x20] sm:$0xff]  ;;  %v354_v22 = vld [vmem:[#allocation5 + $0x48] sm:$0xff]  ;;  %v451_v24 = vld [vmem:[#allocation7 + $0x30] sm:$0xff] }
  0x8b   : > { %v353_v21 = vld [vmem:[#allocation5 + $0x40] sm:$0xff]  ;;  %v985_v23 = vpack.c.bf16 %v450_v19, %v449_v18  ;;  %v452_v25 = vld [vmem:[#allocation7 + $0x38] sm:$0xff]  ;;  %v355_v27 = vld [vmem:[#allocation5 + $0x50] sm:$0xff] }
  0x8c   : > { %978 = vmatprep.subr.bf16.mxu1 %v977_v15  ;;  %v961_v26 = vpack.c.bf16 %v354_v22, %v353_v21  ;;  %v356_v28 = vld [vmem:[#allocation5 + $0x58] sm:$0xff]  ;;  %v989_v29 = vpack.c.bf16 %v452_v25, %v451_v24  ;;  %v453_v30 = vld [vmem:[#allocation7 + $0x40] sm:$0xff]  ;;  %v454_v31 = vld [vmem:[#allocation7 + $0x48] sm:$0xff] }
  0x8d   : > { %952 = vmatpush3.bf16.msra.mxu0 %v949_v5  ;;  %980 = vmatpush3.bf16.msra.mxu1 %v977_v15  ;;  %v965_v32 = vpack.c.bf16 %v356_v28, %v355_v27  ;;  %v357_v33 = vld [vmem:[#allocation5 + $0x60] sm:$0xff]  ;;  %v358_v34 = vld [vmem:[#allocation5 + $0x68] sm:$0xff]  ;;  %v993_v35 = vpack.c.bf16 %v454_v31, %v453_v30  ;;  %v455_v36 = vld [vmem:[#allocation7 + $0x50] sm:$0xff] }
  0x8e   : > { %954 = vmatprep.subr.bf16.mxu0 %v953_v8  ;;  %982 = vmatprep.subr.bf16.mxu1 %v981_v17  ;;  %v456_v37 = vld [vmem:[#allocation7 + $0x58] sm:$0xff]  ;;  %v969_v38 = vpack.c.bf16 %v358_v34, %v357_v33  ;;  %v359_v39 = vld [vmem:[#allocation5 + $0x70] sm:$0xff]  ;;  %v457_v42 = vld [vmem:[#allocation7 + $0x60] sm:$0xff] }
  0x8f   : > { %v360_v40 = vld [vmem:[#allocation5 + $0x78] sm:$0xff]  ;;  %v997_v41 = vpack.c.bf16 %v456_v37, %v455_v36  ;;  %v458_v43 = vld [vmem:[#allocation7 + $0x68] sm:$0xff]  ;;  %v459_v47 = vld [vmem:[#allocation7 + $0x70] sm:$0xff] }
  0x90   : > { %v973_v44 = vpack.c.bf16 %v360_v40, %v359_v39  ;;  %v1001_v45 = vpack.c.bf16 %v458_v43, %v457_v42  ;;  %v344_v46 = vld [vmem:[%s1571_s8 + $0x8] sm:$0xff]  ;;  %v545_v50 = vld [vmem:[#allocation8] sm:$0xff]  ;;  %v547_v52 = vld [vmem:[#allocation8 + $0x10] sm:$0xff]  ;;  %s1236_s8 = scalar_lea.vmem %s1599_s14, 256 }
  0x91   : > { %956 = vmatpush3.bf16.msra.mxu0 %v953_v8  ;;  %984 = vmatpush3.bf16.msra.mxu1 %v981_v17  ;;  %v460_v48 = vld [vmem:[#allocation7 + $0x78] sm:$0xff]  ;;  %v546_v51 = vld [vmem:[#allocation8 + $0x8] sm:$0xff]  ;;  %v549_v56 = vld [vmem:[#allocation8 + $0x20] sm:$0xff]  ;;  %p1237_p0 = scmp.ne.s32.totalorder %s1599_s14, %s1236_s8  ;;  %p1244_p1 = scmp.lt.s32.totalorder %s1242_s9, %s1236_s8 }
  0x92   : > { %958 = vmatprep.subr.bf16.mxu0 %v957_v20  ;;  %986 = vmatprep.subr.bf16.mxu1 %v985_v23  ;;  %v1005_v49 = vpack.c.bf16 %v460_v48, %v459_v47  ;;  %v1009_v53 = vpack.c.bf16 %v546_v51, %v545_v50  ;;  %v548_v54 = vld [vmem:[#allocation8 + $0x18] sm:$0xff]  ;;  %v550_v57 = vld [vmem:[#allocation8 + $0x28] sm:$0xff]  ;;  %v551_v59 = vld [vmem:[#allocation8 + $0x30] sm:$0xff] }
  0x93   : > { %v1013_v55 = vpack.c.bf16 %v548_v54, %v547_v52  ;;  %v1017_v58 = vpack.c.bf16 %v550_v57, %v549_v56  ;;  %v552_v60 = vld [vmem:[#allocation8 + $0x38] sm:$0xff]  ;;  %v553_v62 = vld [vmem:[#allocation8 + $0x40] sm:$0xff]  ;;  %v554_v63 = vld [vmem:[#allocation8 + $0x48] sm:$0xff]  ;;  %p1238_p3 = pnand %p1237_p0, %p1514_p5  ;;  %p1245_p2 = por %p1244_p1, %p1243_p11 }
  0x94   : > { %v1021_v61 = vpack.c.bf16 %v552_v60, %v551_v59  ;;  %v1025_v0 = vpack.c.bf16 %v554_v63, %v553_v62  ;;  %v555_v1 = vld [vmem:[#allocation8 + $0x50] sm:$0xff]  ;;  %v556_v2 = vld [vmem:[#allocation8 + $0x58] sm:$0xff]  ;;  %v557_v4 = vld [vmem:[#allocation8 + $0x60] sm:$0xff] }
  0x95   : > { %960 = vmatpush3.bf16.msra.mxu0 %v957_v20  ;;  %988 = vmatpush3.bf16.msra.mxu1 %v985_v23  ;;  %v1029_v3 = vpack.c.bf16 %v556_v2, %v555_v1  ;;  %v558_v5 = vld [vmem:[#allocation8 + $0x68] sm:$0xff]  ;;  %v776_v7 = vld [vmem:[%s1649_s2] ss:$0 sm:$0xff]  ;;  %v559_v14 = vld [vmem:[#allocation8 + $0x70] sm:$0xff]  ;;  %p1239_p7 = pneg %p1238_p3 }
  0x96   : > { %962 = vmatprep.subr.bf16.mxu0 %v961_v26  ;;  %990 = vmatprep.subr.bf16.mxu1 %v989_v29  ;;  %v1033_v6 = vpack.c.bf16 %v558_v5, %v557_v4  ;;  %v560_v15 = vld [vmem:[#allocation8 + $0x78] sm:$0xff]  ;;  %v777_v17 = vld [vmem:[%s1651_s4] ss:$0 sm:$0xff] }
  0x97   : > { %v1037_v16 = vpack.c.bf16 %v560_v15, %v559_v14  ;;  %v778_v24 = vld [vmem:[%s1653_s6] ss:$0 sm:$0xff]  ;;  %p1246_p4 = pnand %p1245_p2, %p1239_p7 }
  0x99   : > { %964 = vmatpush3.bf16.msra.mxu0 %v961_v26  ;;  %992 = vmatpush3.bf16.msra.mxu1 %v989_v29 }
  0x9a   : > { %966 = vmatprep.subr.bf16.mxu0 %v965_v32  ;;  %994 = vmatprep.subr.bf16.mxu1 %v993_v35 }
  0x9d   : > { %968 = vmatpush3.bf16.msra.mxu0 %v965_v32  ;;  %996 = vmatpush3.bf16.msra.mxu1 %v993_v35 }
  0x9e   : > { %970 = vmatprep.subr.bf16.mxu0 %v969_v38  ;;  %998 = vmatprep.subr.bf16.mxu1 %v997_v41 }
  0xa1   : > { %972 = vmatpush3.bf16.msra.mxu0 %v969_v38  ;;  %1000 = vmatpush3.bf16.msra.mxu1 %v997_v41 }
  0xa2   : > { %974 = vmatprep.subr.bf16.mxu0 %v973_v44  ;;  %1002 = vmatprep.subr.bf16.mxu1 %v1001_v45 }
  0xa5   : > { %976 = vmatpush3.bf16.msra.mxu0 %v973_v44  ;;  %1004 = vmatpush3.bf16.msra.mxu1 %v1001_v45 }
  0xa6   : > { %1006 = vmatprep.subr.bf16.mxu1 %v1005_v49  ;;  %1010 = vmatprep.subr.bf16.mxu0 %v1009_v53 }
  0xa8   : > { %873 = vmatmul.mubr.f32.vlgmr.msra.gmra.mrb[0].mxu0 %v344_v46 }
  0xa9   : > { %1008 = vmatpush3.bf16.msra.mxu1 %v1005_v49  ;;  %1012 = vmatpush3.bf16.msra.mxu0 %v1009_v53 }
  0xaa   : > { %1014 = vmatprep.subr.bf16.mxu0 %v1013_v55 }
  0xad   : > { %1016 = vmatpush3.bf16.msra.mxu0 %v1013_v55 }
  0xae   : > { %1018 = vmatprep.subr.bf16.mxu0 %v1017_v58 }
  0xb1   : > { %1020 = vmatpush3.bf16.msra.mxu0 %v1017_v58 }
  0xb2   : > { %1022 = vmatprep.subr.bf16.mxu0 %v1021_v61 }
  0xb5   : > { %1024 = vmatpush3.bf16.msra.mxu0 %v1021_v61 }
  0xb6   : > { %1026 = vmatprep.subr.bf16.mxu0 %v1025_v0 }
  0xb9   : > { %1028 = vmatpush3.bf16.msra.mxu0 %v1025_v0 }
  0xba   : > { %1030 = vmatprep.subr.bf16.mxu0 %v1029_v3 }
  0xbd   : > { %1032 = vmatpush3.bf16.msra.mxu0 %v1029_v3 }
  0xbe   : > { %1034 = vmatprep.subr.bf16.mxu0 %v1033_v6 }
  0xc1   : > { %1036 = vmatpush3.bf16.msra.mxu0 %v1033_v6 }
  0xc2   : > { %1038 = vmatprep.subr.bf16.mxu0 %v1037_v16 }
  0xc5   : > { %1040 = vmatpush3.bf16.msra.mxu0 %v1037_v16 }
 0x17b   : > { %v874_v8 = vpop.f32.mrb[0].mxu0 }
 0x17c   : > { %v440_v9 = vadd.f32 %v874_v8, %v776_v7  ;;  %v434_v10 = vpop.f32.mrb[1].mxu0 }
 0x17d   : > { %v435_v11 = vadd.f32 %v776_v7, %v434_v10 }
 0x17e   : > { %v444_v13 = vmax.f32 %v440_v9, 0.0 }
 0x17f   : > { %v443_v12 = vmax.f32 %v435_v11, 0.0 }
 0x181   : > { %907 = vmatprep.mubr.f32.mxu1 %v443_v12 }
 0x182   : > { %908 = vmatmul.mubr.f32.vlgmr.msra.gmra.mrb[0].mxu1 %v444_v13 }
 0x255   : > { %v909_v18 = vpop.f32.mrb[0].mxu1 }
 0x256   : > { %v540_v19 = vadd.f32 %v909_v18, %v777_v17  ;;  %v534_v20 = vpop.f32.mrb[1].mxu1 }
 0x257   : > { %v535_v21 = vadd.f32 %v777_v17, %v534_v20 }
 0x258   : > { %v544_v23 = vmax.f32 %v540_v19, 0.0 }
 0x259   : > { %v543_v22 = vmax.f32 %v535_v21, 0.0 }
 0x25b   : > { %942 = vmatprep.mubr.f32.mxu0 %v543_v22 }
 0x25c   : > { %943 = vmatmul.mubr.f32.vlgmr.msra.gmra.mrb[2].mxu0 %v544_v23 }
 0x32f   : > { %v944_v25 = vpop.f32.mrb[2].mxu0 }
 0x330   : > { %v640_v26 = vadd.f32 %v944_v25, %v778_v24  ;;  %v634_v27 = vpop.f32.mrb[3].mxu0 }
 0x331   : > { %v635_v28 = vadd.f32 %v778_v24, %v634_v27 }
 0x332   : > { %644 = vst [vmem:[%s340_s10 + $0x8] sm:$0xff] %v640_v26 }
 0x333   : > { %643 = vst [vmem:[%s340_s10] sm:$0xff] %v635_v28 }
 0x334   : > { %1249 = shalt.err (!%p1246_p4)
}
 0x335   : > { %s1250_s13 = scalar_lea.hbm %s1604_s11, 256  ;;  %s1254_s12 = scalar_lea.hbm %s1654_s7, 768 }
 0x336   : > { %p1251_p9 = scmp.ne.s32.totalorder %s1604_s11, %s1250_s13  ;;  %p1255_p8 = scmp.lt.u32.totalorder %s1604_s11, %s1654_s7 }
 0x337   : > { %p1256_p12 = scmp.lt.u32.totalorder %s1254_s12, %s1250_s13  ;;  %p1258_p0 = scmp.lt.u32.totalorder %s1250_s13, %s1604_s11 }
 0x338   : > { %p1252_p13 = pnand %p1251_p9, %p1514_p5 }
 0x339   : > { %p1257_p6 = por %p1256_p12, %p1255_p8 }
 0x33a   : > { %p1253_p10 = pneg %p1252_p13 }
 0x33b   : > { %p1259_p3 = por %p1258_p0, %p1257_p6 }
 0x33d   : > { %p1260_p7 = pnand %p1259_p3, %p1253_p10 }
 0x33f   : > { %1263 = shalt.err (!%p1260_p7)
}
 0x340   : > { %s1319_s16 = smov 128   ;;  %s1320_s29 = smov 8  }
 0x341   : > { %1055 = dma.vmem_to_hbm [thread:$0]  (%p1514_p5), %s1599_s14, 256, %s1604_s11, %s646_s23, %s1319_s16, %s1319_s16, %s1320_s29  }
 0x342 PF: > { %s1674_s8 = sld [smem:[#allocation15_spill]]  ;;  %p1082_p11 = scmp.ge.s32.totalorder %s1310_s27, 2 }
 0x343   : > { %s674_s28 = sand.u32 1, %s1298_s24  }
 0x344   : > { %s675_s30 = scalar_lea.sflag [#allocation4], %s674_s28 }
 0x348   : > { %p1675_p1 = scmp.ne.s32.totalorder %s1674_s8, 0 }
 0x34a   : > { %p1072_p2 = pnand %p1082_p11, %p1675_p1 }
 0x34c   : > { %1293 = dma.done.wait (!%p1072_p2), %s675_s30, 256  }
 0x34d   : > { %1295 = vsyncadd (!%p1072_p2), %s675_s30, 4294967040  ;;  %p22_p4 = scmp.ge.s32.totalorder %s1500_s22, 5   ;;  %s1676_s24 = smov %s1302_s25 }
 0x34e   : > { %s1677_s25 = smov %s1306_s26  ;;  %s1678_s26 = smov %s1510_s18 }
 0x34f   : > { %s1679_s27 = smov %s1500_s22  ;;  %24 = sbr.rel (!%p22_p4) target bundleno = 7 (0x7), region = 105 }
 0x356   :  { %680 = vsyncpa [#allocation3], 1 }
 0x357   :  { %682 = vsyncpa [#allocation3 + $0x1], 1 }
 0x358   :  { %683 = vsyncpa [#allocation6], 1 }
 0x359   :  { %684 = vsyncpa [#allocation9], 1 }
 0x35a   :  { %685 = vsyncpa [#allocation4], 1 }
 0x35b   :  { %687 = vsyncpa [#allocation4 + $0x1], 1 }

</bundles_post_ra>
